<compile_context>
chip_gen: v7x
topology: tpu7x:2x2x1
jax: 0.10.0
libtpu: 0.0.40
codegen_flags: <defaults>
</compile_context>

<pallas_src>
import numpy as np
import jax
import jax.numpy as jnp
from jax.experimental import pallas as pl
from jax.experimental.pallas import tpu as pltpu


# ---------------------------------------------------------------------------
# Host-side glue: pooling / upsampling matrices (pure numpy, deterministic)
# ---------------------------------------------------------------------------
def _adaptive_pool_matrix(h, w, s):
    """(s*s, h*w) matrix P so that P @ x_flat == AdaptiveAvgPool2d(s)(x) flattened."""
    P = np.zeros((s * s, h * w), dtype=np.float32)

    def bounds(i, n, s_):
        start = (i * n) // s_
        end = -((-(i + 1) * n) // s_)  # ceil((i+1)*n / s_)
        return start, end

    for i in range(s):
        rs, re = bounds(i, h, s)
        for j in range(s):
            cs, ce = bounds(j, w, s)
            cnt = (re - rs) * (ce - cs)
            for a in range(rs, re):
                for b in range(cs, ce):
                    P[i * s + j, a * w + b] = 1.0 / cnt
    return P


def _bilinear_1d(out_n, in_n):
    """(out_n, in_n) bilinear interpolation weights, align_corners=False."""
    M = np.zeros((out_n, in_n), dtype=np.float32)
    if in_n == 1:
        M[:, 0] = 1.0
        return M
    scale = in_n / out_n
    for i in range(out_n):
        src = max((i + 0.5) * scale - 0.5, 0.0)
        i0 = min(int(np.floor(src)), in_n - 1)
        i1 = min(i0 + 1, in_n - 1)
        lam = src - i0
        M[i, i0] += 1.0 - lam
        M[i, i1] += lam
    return M


def _upsample_matrix(h, w, s):
    """(h*w, s*s) matrix U so that U @ feat_flat == bilinear upsample to (h, w)."""
    return np.kron(_bilinear_1d(h, s), _bilinear_1d(w, s)).astype(np.float32)


def build_packed_operands(H, W, setting, Wc, scale, shift, w1x, w1l, b1):
    """Pack per-level operators into level-concatenated, BN-folded operands.

    Returns (PT, UT, WcT, shift_col, w1mask, w1x_col, b1_arr) with shapes
      PT:      (HW, SSpad)   pooling,  level-concatenated, transposed
      UT:      (SSpad, HW)   upsample, level-concatenated, transposed
      WcT:     (L*R, C)      1x1 conv weights with BN scale folded in
      shift:   (L*R, 1)      BN shift (bias after fold)
      w1mask:  (L*R, SSpad)  conv1 pyramid-slice weights masked to owning level
      w1x_col: (C, 1)        conv1 raw-x slice weights
      b1_arr:  (1,)          conv1 bias (SMEM scalar)
    """
    L = len(setting)
    C = Wc.shape[1]
    R = Wc.shape[2]
    HW = H * W
    sizes = [s * s for s in setting]
    offs = np.cumsum([0] + sizes)
    ss_total = int(offs[-1])
    sspad = int(np.ceil(ss_total / 8.0) * 8)  # ragged level concat, one small pad

    w1l_np = np.asarray(w1l, np.float32)
    PT = np.zeros((HW, sspad), np.float32)
    UT = np.zeros((sspad, HW), np.float32)
    w1mask = np.zeros((L * R, sspad), np.float32)
    for l, s in enumerate(setting):
        P_l = _adaptive_pool_matrix(H, W, s)          # (ss, HW)
        U_l = _upsample_matrix(H, W, s)               # (HW, ss)
        PT[:, offs[l]:offs[l + 1]] = P_l.T
        UT[offs[l]:offs[l + 1], :] = U_l.T
        w1mask[l * R:(l + 1) * R, offs[l]:offs[l + 1]] = w1l_np[l][:, None]

    # Fold eval-mode BN scale into the 1x1 conv weights; keep shift as bias.
    WcT = (np.transpose(np.asarray(Wc, np.float32), (0, 2, 1))
           * np.asarray(scale, np.float32)[:, :, None]).reshape(L * R, C)
    shift_col = np.asarray(shift, np.float32).reshape(L * R, 1)
    w1x_col = np.asarray(w1x, np.float32).reshape(C, 1)
    b1_arr = np.asarray(b1, np.float32).reshape(1)

    return (jnp.asarray(PT), jnp.asarray(UT), jnp.asarray(WcT),
            jnp.asarray(shift_col), jnp.asarray(w1mask),
            jnp.asarray(w1x_col), jnp.asarray(b1_arr))


# ---------------------------------------------------------------------------
# Pallas kernel (one batch element per grid step; weights resident in VMEM)
# ---------------------------------------------------------------------------
def ppm_kernel(x_ref, PT_ref, UT_ref, WcT_ref, shift_ref, w1mask_ref,
               w1x_ref, b1_ref, o_ref):
    xf = x_ref[...]                                                       # (C, HW)

    # All pyramid levels pooled in one matmul: (C, SSpad)
    pooled = jnp.dot(xf, PT_ref[...], preferred_element_type=jnp.float32)

    # All per-level 1x1 convs (BN scale folded) in one matmul: (L*R, SSpad)
    feat = jnp.dot(WcT_ref[...], pooled, preferred_element_type=jnp.float32)
    feat = jnp.maximum(feat + shift_ref[...], 0.0)                        # BN shift + ReLU

    # conv1 pyramid slice applied BEFORE upsampling (exact reassociation);
    # the mask zeroes columns belonging to other levels / padding.  VPU work.
    v = jnp.sum(feat * w1mask_ref[...], axis=0, keepdims=True)            # (1, SSpad)

    # Bilinear upsample of the already conv1-reduced scalar map: one MXU push.
    acc = jnp.dot(v, UT_ref[...], preferred_element_type=jnp.float32)     # (1, HW)

    # conv1 raw-x slice: broadcast-multiply + small sublane reduce (VPU) + bias.
    acc = acc + jnp.sum(xf * w1x_ref[...], axis=0, keepdims=True) + b1_ref[0]

    # Final broadcast multiply, stored lane-dense (HW = multiple of 128).
    o_ref[...] = (xf * acc).astype(o_ref.dtype)


def pyramid_pooling_forward(x_nchw, PT, UT, WcT, shift, w1mask, w1x, b1):
    N, C, H, W = x_nchw.shape
    HW = H * W
    SSpad = PT.shape[1]
    LR = WcT.shape[0]

    xf = x_nchw.reshape(N, C, HW)  # pure reshape, no transpose / relayout

    out_flat = pl.pallas_call(
        ppm_kernel,
        out_shape=jax.ShapeDtypeStruct((N, C, HW), x_nchw.dtype),
        grid_spec=pltpu.PrefetchScalarGridSpec(
            num_scalar_prefetch=0,
            grid=(N,),
            in_specs=[
                pl.BlockSpec((None, C, HW), lambda n: (n, 0, 0)),    # x   (C, HW)
                pl.BlockSpec((HW, SSpad), lambda n: (0, 0)),         # PT
                pl.BlockSpec((SSpad, HW), lambda n: (0, 0)),         # UT
                pl.BlockSpec((LR, C), lambda n: (0, 0)),             # WcT (scale folded)
                pl.BlockSpec((LR, 1), lambda n: (0, 0)),             # BN shift
                pl.BlockSpec((LR, SSpad), lambda n: (0, 0)),         # conv1 level mask
                pl.BlockSpec((C, 1), lambda n: (0, 0)),              # conv1 x-slice
                pl.BlockSpec(memory_space=pltpu.MemorySpace.SMEM),   # conv1 bias (scalar)
            ],
            out_specs=pl.BlockSpec((None, C, HW), lambda n: (n, 0, 0)),
        ),
        compiler_params=pltpu.CompilerParams(
            dimension_semantics=("parallel",)),
    )(xf, PT, UT, WcT, shift, w1mask, w1x, b1)

    return out_flat.reshape(N, C, H, W)


# ---------------------------------------------------------------------------
# Pure-JAX reference (mirrors the PyTorch module level-by-level, no packing)
# ---------------------------------------------------------------------------
def reference_forward(x_nchw, P_list, U_list, Wc, scale, shift, w1x, w1l, b1):
    N, C, H, W = x_nchw.shape
    xf = x_nchw.reshape(N, C, H * W)                                  # (N, C, HW)
    out1 = jnp.einsum("c,ncp->np", w1x, xf) + b1                      # conv1 x-slice
    for l, (P_l, U_l) in enumerate(zip(P_list, U_list)):
        pooled = jnp.einsum("sp,ncp->ncs", P_l, xf)                   # adaptive avg pool
        conv = jnp.einsum("cr,ncs->nrs", Wc[l], pooled)               # 1x1 conv
        feat = jnp.maximum(conv * scale[l][None, :, None]
                           + shift[l][None, :, None], 0.0)            # BN (eval) + ReLU
        up = jnp.einsum("ps,nrs->nrp", U_l, feat)                     # bilinear upsample
        out1 = out1 + jnp.einsum("r,nrp->np", w1l[l], up)             # conv1 level slice
    out = xf * out1[:, None, :]
    return out.reshape(N, C, H, W)


if __name__ == "__main__":
    # Small deterministic config: in_dim=4, reduction_dim=4, setting=(1,2,3,6)
    N, C, H, W = 2, 4, 16, 16
    R = 4
    setting = (1, 2, 3, 6)
    L = len(setting)
    eps = 1e-5

    key = jax.random.PRNGKey(0)
    ks = jax.random.split(key, 8)

    x = jax.random.normal(ks[0], (N, C, H, W), dtype=jnp.float32)

    # Per-level 1x1 conv (no bias): PyTorch weight (R, C, 1, 1) stored as (C, R)
    Wc = 0.3 * jax.random.normal(ks[1], (L, C, R), dtype=jnp.float32)
    # BatchNorm (eval-mode) params, folded to per-channel scale/shift
    gamma = 1.0 + 0.1 * jax.random.normal(ks[2], (L, R), dtype=jnp.float32)
    beta = 0.1 * jax.random.normal(ks[3], (L, R), dtype=jnp.float32)
    run_mean = 0.05 * jax.random.normal(ks[4], (L, R), dtype=jnp.float32)
    run_var = jnp.abs(0.1 * jax.random.normal(ks[5], (L, R), dtype=jnp.float32)) + 1.0
    scale = gamma / jnp.sqrt(run_var + eps)
    shift = beta - run_mean * scale

    # conv1: Conv2d(R*4 + C, 1, kernel_size=1) with bias; concat order = [x, level0..3]
    Ctot = R * L + C
    w1 = 0.2 * jax.random.normal(ks[6], (Ctot,), dtype=jnp.float32)
    w1x = w1[:C]                   # (C,)
    w1l = w1[C:].reshape(L, R)     # (L, R)
    b1 = 0.1 * jax.random.normal(ks[7], (), dtype=jnp.float32)

    # Per-level pool / upsample matrices for the reference
    P_list = [jnp.asarray(_adaptive_pool_matrix(H, W, s)) for s in setting]
    U_list = [jnp.asarray(_upsample_matrix(H, W, s)) for s in setting]

    # Packed, BN-folded, level-concatenated operands for the Pallas kernel
    packed = build_packed_operands(H, W, setting, Wc, scale, shift, w1x, w1l, b1)

    out = pyramid_pooling_forward(x, *packed)
    out = jax.block_until_ready(out)

    ref = reference_forward(x, P_list, U_list, Wc, scale, shift, w1x, w1l, b1)
    assert out.shape == (N, C, H, W)
    assert jnp.allclose(out, ref, atol=1e-4, rtol=1e-4), "mismatch vs JAX reference"

    print("KERNEL_OK")
</pallas_src>

<mosaic_0001>
module attributes {stable_mosaic.version = 11 : i64} {
  func.func @ppm_kernel(%arg0: i32, %arg1: memref<1x4x256xf32, #tpu.memory_space<vmem>>, %arg2: memref<256x56xf32, #tpu.memory_space<vmem>>, %arg3: memref<56x256xf32, #tpu.memory_space<vmem>>, %arg4: memref<16x4xf32, #tpu.memory_space<vmem>>, %arg5: memref<16x1xf32, #tpu.memory_space<vmem>>, %arg6: memref<16x56xf32, #tpu.memory_space<vmem>>, %arg7: memref<4x1xf32, #tpu.memory_space<vmem>>, %arg8: memref<1xf32, #tpu.memory_space<smem>>, %arg9: memref<1x4x256xf32, #tpu.memory_space<vmem>>) attributes {dimension_semantics = [#tpu.dimension_semantics<parallel>], iteration_bounds = array<i64: 2>, scalar_prefetch = 0 : i64, scratch_operands = 0 : i64, tpu.core_type = #tpu.core_type<tc>, window_params = [{transform_indices = @transform_0, window_bounds = array<i64: 1, 4, 256>}, {pipeline_mode = #tpu.pipeline_mode<synchronous>, transform_indices = @transform_1, window_bounds = array<i64: 256, 56>}, {pipeline_mode = #tpu.pipeline_mode<synchronous>, transform_indices = @transform_2, window_bounds = array<i64: 56, 256>}, {pipeline_mode = #tpu.pipeline_mode<synchronous>, transform_indices = @transform_3, window_bounds = array<i64: 16, 4>}, {pipeline_mode = #tpu.pipeline_mode<synchronous>, transform_indices = @transform_4, window_bounds = array<i64: 16, 1>}, {pipeline_mode = #tpu.pipeline_mode<synchronous>, transform_indices = @transform_5, window_bounds = array<i64: 16, 56>}, {pipeline_mode = #tpu.pipeline_mode<synchronous>, transform_indices = @transform_6, window_bounds = array<i64: 4, 1>}, {transform_indices = @transform_7, window_bounds = array<i64: 1>}, {transform_indices = @transform_8, window_bounds = array<i64: 1, 4, 256>}]} {
    %c0 = arith.constant 0 : index
    %c0_0 = arith.constant 0 : index
    %c0_1 = arith.constant 0 : index
    %0 = vector.load %arg1[%c0, %c0_0, %c0_1] : memref<1x4x256xf32, #tpu.memory_space<vmem>>, vector<1x4x256xf32>
    %1 = vector.shape_cast %0 : vector<1x4x256xf32> to vector<4x256xf32>
    %c0_2 = arith.constant 0 : index
    %c0_3 = arith.constant 0 : index
    %2 = vector.load %arg2[%c0_2, %c0_3] : memref<256x56xf32, #tpu.memory_space<vmem>>, vector<256x56xf32>
    %cst = arith.constant dense<0.000000e+00> : vector<4x56xf32>
    %3 = tpu.matmul %1, %2, %cst {dimension_numbers = #tpu.dot_dimension_numbers<[1], [0], [0], [1], [0, 0, 1, 1], [], []>} : vector<4x256xf32>, vector<256x56xf32>, vector<4x56xf32> -> vector<4x56xf32>
    %c0_4 = arith.constant 0 : index
    %c0_5 = arith.constant 0 : index
    %4 = vector.load %arg4[%c0_4, %c0_5] : memref<16x4xf32, #tpu.memory_space<vmem>>, vector<16x4xf32>
    %cst_6 = arith.constant dense<0.000000e+00> : vector<16x56xf32>
    %5 = tpu.matmul %4, %3, %cst_6 {dimension_numbers = #tpu.dot_dimension_numbers<[1], [0], [0], [1], [0, 0, 1, 1], [], []>} : vector<16x4xf32>, vector<4x56xf32>, vector<16x56xf32> -> vector<16x56xf32>
    %c0_7 = arith.constant 0 : index
    %c0_8 = arith.constant 0 : index
    %6 = vector.load %arg5[%c0_7, %c0_8] : memref<16x1xf32, #tpu.memory_space<vmem>>, vector<16x1xf32>
    %7 = vector.broadcast %6 : vector<16x1xf32> to vector<16x56xf32>
    %8 = arith.addf %5, %7 : vector<16x56xf32>
    %cst_9 = arith.constant 0.000000e+00 : f32
    %9 = vector.broadcast %cst_9 : f32 to vector<16x56xf32>
    %10 = arith.maximumf %8, %9 : vector<16x56xf32>
    %c0_10 = arith.constant 0 : index
    %c0_11 = arith.constant 0 : index
    %11 = vector.load %arg6[%c0_10, %c0_11] : memref<16x56xf32, #tpu.memory_space<vmem>>, vector<16x56xf32>
    %12 = arith.mulf %10, %11 : vector<16x56xf32>
    %cst_12 = arith.constant dense<0.000000e+00> : vector<56xf32>
    %13 = vector.multi_reduction <add>, %12, %cst_12 [0] : vector<16x56xf32> to vector<56xf32>
    %14 = vector.shape_cast %13 : vector<56xf32> to vector<1x56xf32>
    %c0_13 = arith.constant 0 : index
    %c0_14 = arith.constant 0 : index
    %15 = vector.load %arg3[%c0_13, %c0_14] : memref<56x256xf32, #tpu.memory_space<vmem>>, vector<56x256xf32>
    %cst_15 = arith.constant dense<0.000000e+00> : vector<1x256xf32>
    %16 = tpu.matmul %14, %15, %cst_15 {dimension_numbers = #tpu.dot_dimension_numbers<[1], [0], [0], [1], [0, 0, 1, 1], [], []>} : vector<1x56xf32>, vector<56x256xf32>, vector<1x256xf32> -> vector<1x256xf32>
    %c0_16 = arith.constant 0 : index
    %c0_17 = arith.constant 0 : index
    %17 = vector.load %arg7[%c0_16, %c0_17] : memref<4x1xf32, #tpu.memory_space<vmem>>, vector<4x1xf32>
    %18 = vector.broadcast %17 : vector<4x1xf32> to vector<4x256xf32>
    %19 = arith.mulf %1, %18 : vector<4x256xf32>
    %cst_18 = arith.constant dense<0.000000e+00> : vector<256xf32>
    %20 = vector.multi_reduction <add>, %19, %cst_18 [0] : vector<4x256xf32> to vector<256xf32>
    %21 = vector.shape_cast %20 : vector<256xf32> to vector<1x256xf32>
    %22 = arith.addf %16, %21 : vector<1x256xf32>
    %c0_19 = arith.constant 0 : index
    %23 = memref.load %arg8[%c0_19] : memref<1xf32, #tpu.memory_space<smem>>
    %24 = vector.broadcast %23 : f32 to vector<1x256xf32>
    %25 = arith.addf %22, %24 : vector<1x256xf32>
    %26 = vector.broadcast %25 : vector<1x256xf32> to vector<4x256xf32>
    %27 = arith.mulf %1, %26 : vector<4x256xf32>
    %c0_20 = arith.constant 0 : index
    %c0_21 = arith.constant 0 : index
    %c0_22 = arith.constant 0 : index
    %28 = vector.load %arg9[%c0_20, %c0_21, %c0_22] : memref<1x4x256xf32, #tpu.memory_space<vmem>>, vector<1x4x256xf32>
    %29 = vector.shape_cast %28 : vector<1x4x256xf32> to vector<4x256xf32>
    %30 = vector.shape_cast %27 : vector<4x256xf32> to vector<1x4x256xf32>
    tpu.vector_store %arg9[%c0_20, %c0_21, %c0_22], %30 {strides = array<i32>} : memref<1x4x256xf32, #tpu.memory_space<vmem>>, vector<1x4x256xf32>,
    return
  }
  func.func @transform_0(%arg0: i32) -> (i32, i32, i32) {
    %c0_i32 = arith.constant 0 : i32
    %c0_i32_0 = arith.constant 0 : i32
    %c0_i32_1 = arith.constant 0 : i32
    return %arg0, %c0_i32, %c0_i32_0 : i32, i32, i32
  }
  func.func @transform_1(%arg0: i32) -> (i32, i32) {
    %c0_i32 = arith.constant 0 : i32
    %c0_i32_0 = arith.constant 0 : i32
    %c0_i32_1 = arith.constant 0 : i32
    return %c0_i32, %c0_i32_0 : i32, i32
  }
  func.func @transform_2(%arg0: i32) -> (i32, i32) {
    %c0_i32 = arith.constant 0 : i32
    %c0_i32_0 = arith.constant 0 : i32
    %c0_i32_1 = arith.constant 0 : i32
    return %c0_i32, %c0_i32_0 : i32, i32
  }
  func.func @transform_3(%arg0: i32) -> (i32, i32) {
    %c0_i32 = arith.constant 0 : i32
    %c0_i32_0 = arith.constant 0 : i32
    %c0_i32_1 = arith.constant 0 : i32
    return %c0_i32, %c0_i32_0 : i32, i32
  }
  func.func @transform_4(%arg0: i32) -> (i32, i32) {
    %c0_i32 = arith.constant 0 : i32
    %c0_i32_0 = arith.constant 0 : i32
    %c0_i32_1 = arith.constant 0 : i32
    return %c0_i32, %c0_i32_0 : i32, i32
  }
  func.func @transform_5(%arg0: i32) -> (i32, i32) {
    %c0_i32 = arith.constant 0 : i32
    %c0_i32_0 = arith.constant 0 : i32
    %c0_i32_1 = arith.constant 0 : i32
    return %c0_i32, %c0_i32_0 : i32, i32
  }
  func.func @transform_6(%arg0: i32) -> (i32, i32) {
    %c0_i32 = arith.constant 0 : i32
    %c0_i32_0 = arith.constant 0 : i32
    %c0_i32_1 = arith.constant 0 : i32
    return %c0_i32, %c0_i32_0 : i32, i32
  }
  func.func @transform_7(%arg0: i32) -> i32 {
    %c0_i32 = arith.constant 0 : i32
    %c0_i32_0 = arith.constant 0 : i32
    return %c0_i32 : i32
  }
  func.func @transform_8(%arg0: i32) -> (i32, i32, i32) {
    %c0_i32 = arith.constant 0 : i32
    %c0_i32_0 = arith.constant 0 : i32
    %c0_i32_1 = arith.constant 0 : i32
    return %arg0, %c0_i32, %c0_i32_0 : i32, i32, i32
  }
}

</mosaic_0001>

<bundles_post_ra>
// kernel: tpu_custom_call.1
= control target key start
LH: loop header
LB: loop body
LE: loop exit
PB: predicated region body
PF: predicated region fallthrough
CT: control target
= control target key end

     0   :  { %s1276_s0 = inlined_call_operand.vmem [shape: f32[2,4,256], index: 0, kind: input, shape index: {}]   ;;  %s1277_s1 = inlined_call_operand.vmem [shape: f32[256,56], index: 1, kind: input, shape index: {}]   ;;  %s1278_s2 = inlined_call_operand.vmem [shape: f32[56,256], index: 2, kind: input, shape index: {}]   ;;  %s1279_s3 = inlined_call_operand.vmem [shape: f32[16,4], index: 3, kind: input, shape index: {}]   ;;  %s1280_s4 = inlined_call_operand.vmem [shape: f32[16,1], index: 4, kind: input, shape index: {}]   ;;  %s1281_s5 = inlined_call_operand.vmem [shape: f32[16,56], index: 5, kind: input, shape index: {}]   ;;  %s1282_s6 = inlined_call_operand.vmem [shape: f32[4,1], index: 6, kind: input, shape index: {}]   ;;  %s1283_s7 = inlined_call_operand.<no memory space> [shape: f32[1], index: 7, kind: input, shape index: {}]   ;;  %s1284_s8 = inlined_call_operand.hbm [shape: f32[2,4,256], index: 8, kind: output, shape index: {}]  }
   0x1   :  { %13 = sst [smem:[#allocation2]] %s1283_s7 }
   0x2   :  { %14 = vsyncpa [#allocation4], 0 }
   0x3   :  { %16 = vsyncpa [#allocation4 + $0x1], 0  ;;  %s1004_s29 = smov 0   ;;  %s1006_s30 = smov 0  }
   0x4   :  { %s1008_s9 = smov 0   ;;  %s1010_s10 = smov 0  }
   0x5 LB: > { %s1025_s7 = sadd.s32 4294967295, %s950_s10   ;;  %s738_s11 = sadd.s32 4294967294, %s950_s10   ;;  %s950_s10 = sphi %s1010_s10, %s1290_s10   ;;  %s946_s9 = sphi %s1008_s9, %s1289_s9   ;;  %s942_s30 = sphi %s1006_s30, %s1288_s30   ;;  %s938_s29 = sphi %s1004_s29, %s1287_s29  }
   0x6   : > { %s1029_s12 = sadd.s32 1, %s950_s10   ;;  %s202_s13 = sadd.s32 1, %s946_s9 }
   0x7   : > { %s199_s14 = ssub.s32 %s950_s10, %s1029_s12  ;;  %p212_p0 = scmp.ne.s32.totalorder %s946_s9, %s942_s30 }
   0x8   : > { %p200_p1 = scmp.eq.s32.totalorder %s199_s14, 0  ;;  %p213_p2 = scmp.eq.s32.totalorder %s1025_s7, 1 }
   0x9   : > { %p218_p3 = scmp.ne.s32.totalorder %s942_s30, %s938_s29  ;;  %p219_p4 = scmp.eq.s32.totalorder %s738_s11, 1 }
   0xa   : > { %s1040_s15 = scalar_select %p200_p1, %s946_s9, %s202_s13  }
   0xb   : > { %p1042_p5 = por %p213_p2, %p212_p0  ;;  %p1046_p6 = por %p219_p4, %p218_p3 }
   0xc   : > { %p741_p7 = scmp.ge.s32.totalorder %s950_s10, 1  ;;  %p266_p8 = scmp.lt.s32.totalorder %s950_s10, 3 }
   0xe   : > { %p267_p9 = pnand %p741_p7, %p266_p8 }
   0xf   : > { %v322_v0 = vld [vmem:[%s1277_s1 + $0x80] sm:$0xff] (!%p267_p9)  ;;  %v323_v1 = vld [vmem:[%s1277_s1 + $0x88] sm:$0xff] (!%p267_p9)  ;;  %p300_p10 = scmp.lt.s32.totalorder (!%p267_p9), %s1025_s7, 1  ;;  %v324_v5 = vld [vmem:[%s1277_s1 + $0x90] sm:$0xff] (!%p267_p9)  ;;  %vm425_vm0 = vcmask (!%p267_p9), 31744   ;;  %v952_v52 = vmov (!%p267_p9), 0  }
  0x10   : > { %270 = sbr.rel (%p267_p9) target bundleno = 738 (0x2e2), region = 52  ;;  %v306_v2 = vld [vmem:[%s1277_s1] sm:$0xff] (!%p267_p9)  ;;  %v799_v3 = vpack.c.bf16 (!%p267_p9), %v323_v1, %v322_v0  ;;  %v307_v4 = vld [vmem:[%s1277_s1 + $0x8] sm:$0xff] (!%p267_p9)  ;;  %v325_v6 = vld [vmem:[%s1277_s1 + $0x98] sm:$0xff] (!%p267_p9)  ;;  %885 = vset.pattern.permute.xlu0 (!%p267_p9), %v952_v52  ;;  %886 = vset.pattern.permute.xlu1 (!%p267_p9), %v952_v52  ;;  %vm432_vm1 = vcmask (!%p267_p9), 1043456   ;;  %vm517_vm2 = vcmask (!%p267_p9), 457728  }
  0x11   : > { %v801_v7 = vpack.c.bf16 (!%p267_p9), %v307_v4, %v306_v2  ;;  %v803_v8 = vpack.c.bf16 (!%p267_p9), %v325_v6, %v324_v5  ;;  %v308_v9 = vld [vmem:[%s1277_s1 + $0x10] sm:$0xff] (!%p267_p9)  ;;  %v309_v10 = vld [vmem:[%s1277_s1 + $0x18] sm:$0xff] (!%p267_p9)  ;;  %v326_v11 = vld [vmem:[%s1277_s1 + $0xa0] sm:$0xff] (!%p267_p9)  ;;  %s297_s18 = sand.u32 (!%p267_p9), 1, %s942_s30   ;;  %s755_s20 = sshll.u32 (!%p267_p9), %s1025_s7, 7 }
  0x12   : > { %800 = vmatprep.subr.bf16.mxu0 (!%p267_p9), %v799_v3  ;;  %v327_v12 = vld [vmem:[%s1277_s1 + $0xa8] sm:$0xff] (!%p267_p9)  ;;  %v805_v13 = vpack.c.bf16 (!%p267_p9), %v309_v10, %v308_v9  ;;  %v310_v15 = vld [vmem:[%s1277_s1 + $0x20] sm:$0xff] (!%p267_p9)  ;;  %v328_v17 = vld [vmem:[%s1277_s1 + $0xb0] sm:$0xff] (!%p267_p9)  ;;  %s742_s19 = sshll.u32 (!%p267_p9), %s297_s18, 3  ;;  %s1234_s26 = scalar_lea.hbm (!%p267_p9), %s1284_s8, %s755_s20 }
  0x13   : > { %802 = vmatpush3.bf16.msra.mxu0 (!%p267_p9), %v801_v7  ;;  %v807_v14 = vpack.c.bf16 (!%p267_p9), %v327_v12, %v326_v11  ;;  %v311_v16 = vld [vmem:[%s1277_s1 + $0x28] sm:$0xff] (!%p267_p9)  ;;  %v329_v18 = vld [vmem:[%s1277_s1 + $0xb8] sm:$0xff] (!%p267_p9)  ;;  %v312_v21 = vld [vmem:[%s1277_s1 + $0x30] sm:$0xff] (!%p267_p9)  ;;  %s299_s21 = scalar_lea.vmem (!%p267_p9), [#allocation3], %s742_s19  ;;  %s665_s27 = scalar_lea.sflag (!%p267_p9), [#allocation4], %s297_s18 }
  0x14   : > { %804 = vmatprep.subr.bf16.mxu0 (!%p267_p9), %v803_v8  ;;  %v809_v19 = vpack.c.bf16 (!%p267_p9), %v311_v16, %v310_v15  ;;  %v811_v20 = vpack.c.bf16 (!%p267_p9), %v329_v18, %v328_v17  ;;  %v313_v22 = vld [vmem:[%s1277_s1 + $0x38] sm:$0xff] (!%p267_p9)  ;;  %v330_v23 = vld [vmem:[%s1277_s1 + $0xc0] sm:$0xff] (!%p267_p9)  ;;  %v331_v24 = vld [vmem:[%s1277_s1 + $0xc8] sm:$0xff] (!%p267_p9)  ;;  %s679_s23 = sshll.u32 (!%p267_p9), %s299_s21, 4  ;;  %s1236_s23 = int_to_ptr.vmem [resolvable:$true] %s679_s23 }
  0x15   : > { %v813_v27 = vpack.c.bf16 (!%p267_p9), %v313_v22, %v312_v21  ;;  %v815_v28 = vpack.c.bf16 (!%p267_p9), %v331_v24, %v330_v23  ;;  %v314_v29 = vld [vmem:[%s1277_s1 + $0x40] sm:$0xff] (!%p267_p9)  ;;  %v315_v30 = vld [vmem:[%s1277_s1 + $0x48] sm:$0xff] (!%p267_p9)  ;;  %v332_v31 = vld [vmem:[%s1277_s1 + $0xd0] sm:$0xff] (!%p267_p9)  ;;  %s888_s28 = scalar_lea.vmem (!%p267_p9), %s1236_s23, 128 }
  0x16   : > { %v333_v32 = vld [vmem:[%s1277_s1 + $0xd8] sm:$0xff] (!%p267_p9)  ;;  %v817_v33 = vpack.c.bf16 (!%p267_p9), %v315_v30, %v314_v29  ;;  %v316_v35 = vld [vmem:[%s1277_s1 + $0x50] sm:$0xff] (!%p267_p9)  ;;  %v334_v37 = vld [vmem:[%s1277_s1 + $0xe0] sm:$0xff] (!%p267_p9)  ;;  %p889_p11 = scmp.ne.s32.totalorder (!%p267_p9), %s1236_s23, %s888_s28 }
  0x17   : > { %s301_s22 = scalar_select %p300_p10, %s1025_s7, 1  ;;  %806 = vmatpush3.bf16.msra.mxu0 %v805_v13  ;;  %v819_v34 = vpack.c.bf16 %v333_v32, %v332_v31  ;;  %v317_v36 = vld [vmem:[%s1277_s1 + $0x58] sm:$0xff]  ;;  %v335_v38 = vld [vmem:[%s1277_s1 + $0xe8] sm:$0xff]  ;;  %v318_v41 = vld [vmem:[%s1277_s1 + $0x60] sm:$0xff] }
  0x18   : > { %808 = vmatprep.subr.bf16.mxu0 %v807_v14  ;;  %v821_v39 = vpack.c.bf16 %v317_v36, %v316_v35  ;;  %v823_v40 = vpack.c.bf16 %v335_v38, %v334_v37  ;;  %v319_v42 = vld [vmem:[%s1277_s1 + $0x68] sm:$0xff]  ;;  %v336_v43 = vld [vmem:[%s1277_s1 + $0xf0] sm:$0xff]  ;;  %v337_v44 = vld [vmem:[%s1277_s1 + $0xf8] sm:$0xff]  ;;  %v953_v14 = vmov 0.0   ;;  %v954_v38 = vmov 839922192   ;;  %p890_p12 = pnand %p889_p11, %p1042_p5 }
  0x19   : > { %s754_s25 = sshll.u32 %s301_s22, 3  ;;  %v825_v45 = vpack.c.bf16 %v319_v42, %v318_v41  ;;  %v827_v46 = vpack.c.bf16 %v337_v44, %v336_v43  ;;  %v320_v47 = vld [vmem:[%s1277_s1 + $0x70] sm:$0xff]  ;;  %v321_v48 = vld [vmem:[%s1277_s1 + $0x78] sm:$0xff]  ;;  %v411_v50 = vld [vmem:[%s1279_s3] sm:$0xff]  ;;  %s955_s7 = smov [#allocation3]  }
  0x1a   : > { %s304_s22 = scalar_lea.vmem %s1276_s0, %s754_s25  ;;  %v829_v49 = vpack.c.bf16 %v321_v48, %v320_v47  ;;  %796 = vmatprep.mubr.msk.f32.mxu1 %vm425_vm0, %v411_v50  ;;  %v413_v51 = vld [vmem:[%s1280_s4] sm:$0xff]  ;;  %v414_v53 = vld [vmem:[%s1280_s4 + $0x8] sm:$0xff]  ;;  %v530_v59 = vld [vmem:[%s1278_s2 + $0x18] sm:$0xff]  ;;  %s646_s25 = sld [smem:[#allocation2]] }
  0x1b   : > { %v1111_v25 = vld [vmem:[%s304_s22] sm:$0xff]  ;;  %810 = vmatpush3.bf16.msra.mxu0 %v809_v19  ;;  %417 = vperm.xlu0 %885, %v413_v51   ;;  %v412_v57 = vld [vmem:[%s1279_s3 + $0x8] sm:$0xff]  ;;  %v529_v62 = vld [vmem:[%s1278_s2 + $0x10] sm:$0xff]  ;;  %p891_p13 = pneg %p890_p12  ;;  %s892_s11 = sshll.u32 %s955_s7, 4  ;;  %s893_s11 = int_to_ptr.vmem [resolvable:$false] %s892_s11 }
  0x1c   : > { %v339_v26 = vcombine.high %v1111_v25, %v1111_v25  ;;  %812 = vmatprep.subr.bf16.mxu0 %v811_v20  ;;  %v528_v58 = vld [vmem:[%s1278_s2 + $0x8] sm:$0xff]  ;;  %v527_v61 = vld [vmem:[%s1278_s2] sm:$0xff]  ;;  %v534_v1 = vld [vmem:[%s1278_s2 + $0x38] sm:$0xff]  ;;  %s894_s13 = scalar_lea.vmem %s893_s11, 256  ;;  %p895_p0 = scmp.lt.s32.totalorder %s1236_s23, %s893_s11 }
  0x1d   : > { %v831_v60 = vpack.c.bf16 %v530_v59, %v528_v58  ;;  %v833_v63 = vpack.c.bf16 %v529_v62, %v527_v61  ;;  %v532_v0 = vld [vmem:[%s1278_s2 + $0x28] sm:$0xff]  ;;  %v531_v3 = vld [vmem:[%s1278_s2 + $0x20] sm:$0xff]  ;;  %v533_v4 = vld [vmem:[%s1278_s2 + $0x30] sm:$0xff]  ;;  %p896_p1 = scmp.lt.s32.totalorder %s894_s13, %s888_s28 }
  0x1e   : > { %405 = vmatprep.mubr.f32.mxu0 %v339_v26  ;;  %v835_v2 = vpack.c.bf16 %v534_v1, %v532_v0  ;;  %v837_v5 = vpack.c.bf16 %v533_v4, %v531_v3  ;;  %v536_v6 = vld [vmem:[%s1278_s2 + $0x48] sm:$0xff]  ;;  %v538_v7 = vld [vmem:[%s1278_s2 + $0x58] sm:$0xff]  ;;  %v535_v9 = vld [vmem:[%s1278_s2 + $0x40] sm:$0xff] }
  0x1f   : > { %814 = vmatpush3.bf16.msra.mxu0 %v813_v27  ;;  %422 = vperm.xlu0 %885, %v414_v53   ;;  %v839_v8 = vpack.c.bf16 %v538_v7, %v536_v6  ;;  %v537_v10 = vld [vmem:[%s1278_s2 + $0x50] sm:$0xff]  ;;  %v540_v12 = vld [vmem:[%s1278_s2 + $0x68] sm:$0xff]  ;;  %v539_v13 = vld [vmem:[%s1278_s2 + $0x60] sm:$0xff]  ;;  %p897_p2 = por %p896_p1, %p895_p0 }
  0x20   : > { %816 = vmatprep.subr.bf16.mxu0 %v815_v28  ;;  %v841_v11 = vpack.c.bf16 %v537_v10, %v535_v9  ;;  %v541_v15 = vld [vmem:[%s1282_s6] sm:$0xf]  ;;  %v514_v21 = vld [vmem:[%s1281_s5 + $0x8] sm:$0xff]  ;;  %v647_v62 = vstv %s646_s25 }
  0x21   : > { %544 = vperm.xlu1 %886, %v541_v15   ;;  %v513_v24 = vld [vmem:[%s1281_s5] sm:$0xff]  ;;  %p898_p3 = pnand %p897_p2, %p891_p13 }
  0x23   : > { %818 = vmatpush3.bf16.msra.mxu0 %v817_v33 }
  0x24   : > { %820 = vmatprep.subr.bf16.mxu0 %v819_v34 }
  0x27   : > { %822 = vmatpush3.bf16.msra.mxu0 %v821_v39  ;;  %v547_v39 = vunpack.c.l.s4 %v954_v38 }
  0x28   : > { %824 = vmatprep.subr.bf16.mxu0 %v823_v40  ;;  %v549_v40 = vlaneseq }
  0x29   : > { %v548_v41 = vunpack.c.0.s8 %v547_v39 }
  0x2a   : > { %v550_v42 = vshrl.u32 %v549_v40, 7 }
  0x2b   : > { %826 = vmatpush3.bf16.msra.mxu0 %v825_v45 }
  0x2c   : > { %828 = vmatprep.subr.bf16.mxu0 %v827_v46  ;;  %v551_v43 = vsub.s32 %v548_v41, %v550_v42  ;;  %v652_v1 = vsub.s32 0, %v550_v42 }
  0x2f   : > { %830 = vmatpush3.bf16.msra.mxu0 %v829_v49 }
  0x32   : > { %406 = vmatmul.mubr.f32.vlgmr.msra.gmra.mrb[0].mxu0 %v1111_v25 }
  0x9a   : > { %v418_v16 = vpop.permute.xlu0 %417 }
  0x9e   : > { %v423_v17 = vpop.permute.xlu0 %422 }
  0xa0   : > { %v545_v44 = vpop.permute.xlu1 %544 }
  0xa1   : > { %v552_v45 = vrot.slane %v545_v44, %v551_v43 }
  0xa3   : > { %v554_v46 = vmul.f32 %v552_v45, %v1111_v25 }
  0xa5   : > { %v556_v47 = vcombine.high %v554_v46, %v554_v46  ;;  %v558_v48 = vsel %vm432_vm1, %v554_v46, 0.0 }
  0xa6   : > { %v559_v50 = vrot.slane %v558_v48, 4 }
  0xa7   : > { %v565_v49 = vsel %vm432_vm1, %v556_v47, 0.0 }
  0xa8   : > { %v566_v51 = vrot.slane %v565_v49, 4  ;;  %v560_v52 = vadd.f32 %v559_v50, %v558_v48 }
  0xaa   : > { %v567_v53 = vadd.f32 %v566_v51, %v565_v49 }
 0x105   : > { %v788_v54 = vpop.f32.mrb[0].mxu0 }
 0x106   : > { %v789_v55 = vpop.f32.mrb[1].mxu0 }
 0x107   : > { %v790_v56 = vadd.f32 %v789_v55, %v788_v54  ;;  %v561_v54 = vrot.slane %v560_v52, 2  ;;  %v568_v55 = vrot.slane %v567_v53, 2 }
 0x109   : > { %794 = vmatprep.subr.msk.mxu1 %vm432_vm1, %v790_v56 }
 0x10a   : > { %795 = vmatpush3.msk.msra.mxu1 %vm432_vm1, %v790_v56  ;;  %v562_v56 = vadd.f32 %v561_v54, %v560_v52 }
 0x10b   : > { %797 = vmatmul.mubr.msk.f32.vlgmr.msra.gmra.mrb[0].mxu1 %vm425_vm0, %v412_v57  ;;  %832 = vmatprep.subr.bf16.mxu1 %v831_v60  ;;  %v569_v57 = vadd.f32 %v568_v55, %v567_v53 }
 0x10c   : > { %834 = vmatpush1.bf16.msra.mxu1 %v833_v63  ;;  %639 = vmatprep.mubr.f32.mxu1 %v953_v14  ;;  %v563_v58 = vrot.slane %v562_v56, 1 }
 0x10d   : > { %836 = vmatprep.subr.bf16.mxu1 %v835_v2  ;;  %v570_v59 = vrot.slane %v569_v57, 1 }
 0x10e   : > { %v564_v60 = vadd.f32 %v563_v58, %v562_v56 }
 0x10f   : > { %v571_v63 = vadd.f32 %v570_v59, %v569_v57 }
 0x110   : > { %838 = vmatpush1.bf16.msra.mxu1 %v837_v5 }
 0x111   : > { %840 = vmatprep.subr.bf16.mxu1 %v839_v8 }
 0x114   : > { %842 = vmatpush1.bf16.msra.mxu1 %v841_v11 }
 0x115   : > { %587 = vmatprep.subr.mxu1 %v540_v12 }
 0x118   : > { %588 = vmatpush1.msra.mxu1 %v539_v13 }
 0x1de   : > { %v798_v18 = vpop.f32.mrb[0].mxu1 }
 0x1df   : > { %v508_v19 = vadd.f32 %v798_v18, %v423_v17  ;;  %v502_v20 = vpop.f32.mrb[1].mxu1 }
 0x1e0   : > { %v503_v22 = vadd.f32 %v502_v20, %v418_v16 }
 0x1e1   : > { %v512_v23 = vmax.f32 %v508_v19, 0.0 }
 0x1e2   : > { %v511_v26 = vmax.f32 %v503_v22, 0.0 }
 0x1e3   : > { %v516_v27 = vmul.f32 %v514_v21, %v512_v23 }
 0x1e4   : > { %v515_v28 = vmul.f32 %v513_v24, %v511_v26 }
 0x1e5   : > { %v519_v29 = vsel %vm517_vm2, %v516_v27, 0.0 }
 0x1e6   : > { %v518_v30 = vsel %vm517_vm2, %v515_v28, 0.0 }
 0x1e7   : > { %v520_v31 = vadd.f32 %v519_v29, %v518_v30 }
 0x1e9   : > { %v521_v32 = vrot.slane %v520_v31, 4 }
 0x1eb   : > { %v522_v33 = vadd.f32 %v521_v32, %v520_v31 }
 0x1ed   : > { %v523_v34 = vrot.slane %v522_v33, 2 }
 0x1ef   : > { %v524_v35 = vadd.f32 %v523_v34, %v522_v33 }
 0x1f1   : > { %v525_v36 = vrot.slane %v524_v35, 1 }
 0x1f3   : > { %v526_v37 = vadd.f32 %v525_v36, %v524_v35 }
 0x1f5   : > { %748 = vmatmul.mubr.msk.f32.vlgmr.msra.gmra.mrb[2].mxu1 %vm517_vm2, %v526_v37 }
 0x2c8   : > { %v641_v61 = vpop.f32.mrb[2].mxu1 }
 0x2c9   : > { %v642_v0 = vadd.f32 %v641_v61, %v564_v60  ;;  %v643_v2 = vpop.f32.mrb[3].mxu1 }
 0x2ca   : > { %v644_v3 = vadd.f32 %v643_v2, %v571_v63 }
 0x2cb   : > { %v648_v4 = vadd.f32 %v647_v62, %v642_v0 }
 0x2cc   : > { %v649_v5 = vadd.f32 %v647_v62, %v644_v3 }
 0x2cd   : > { %v653_v6 = vrot.slane %v648_v4, %v652_v1 }
 0x2ce   : > { %v657_v7 = vrot.slane %v649_v5, %v652_v1 }
 0x2d0   : > { %v660_v8 = vcombine.low %v653_v6, %v657_v7 }
 0x2d2   : > { %v662_v9 = vmul.f32 %v660_v8, %v1111_v25 }
 0x2d4   : > { %663 = vst [vmem:[%s299_s21] sm:$0xff] %v662_v9 }
 0x2d5   : > { %901 = shalt.err (!%p898_p3)
}
 0x2d6   : > { %s902_s14 = scalar_lea.hbm %s1234_s26, 128  ;;  %s906_s19 = scalar_lea.hbm %s1284_s8, 256 }
 0x2d7   : > { %p903_p4 = scmp.ne.s32.totalorder %s1234_s26, %s902_s14  ;;  %p907_p9 = scmp.lt.u32.totalorder %s1234_s26, %s1284_s8 }
 0x2d8   : > { %p908_p10 = scmp.lt.u32.totalorder %s906_s19, %s902_s14  ;;  %p910_p12 = scmp.lt.u32.totalorder %s902_s14, %s1234_s26 }
 0x2d9   : > { %p904_p7 = pnand %p903_p4, %p1042_p5 }
 0x2da   : > { %p909_p11 = por %p908_p10, %p907_p9 }
 0x2db   : > { %p905_p8 = pneg %p904_p7 }
 0x2dc   : > { %p911_p13 = por %p910_p12, %p909_p11 }
 0x2de   : > { %p912_p0 = pnand %p911_p13, %p905_p8 }
 0x2e0   : > { %915 = shalt.err (!%p912_p0)
}
 0x2e1   : > { %843 = dma.vmem_to_hbm [thread:$0]  (%p1042_p5), %s1236_s23, 128, %s1234_s26, %s665_s27  }
 0x2e2 PF: > { %p849_p1 = scmp.ge.s32.totalorder %s950_s10, 2  ;;  %s691_s22 = sand.u32 1, %s938_s29  }
 0x2e3   : > { %s692_s24 = scalar_lea.sflag [#allocation4], %s691_s22 }
 0x2e4   : > { %p846_p2 = pnand %p849_p1, %p1046_p6 }
 0x2e6   : > { %933 = dma.done.wait (!%p846_p2), %s692_s24, 128  }
 0x2e7   : > { %935 = vsyncadd (!%p846_p2), %s692_s24, 4294967168  ;;  %p19_p3 = scmp.ge.s32.totalorder %s1029_s12, 4   ;;  %s1287_s29 = smov %s942_s30 }
 0x2e8   : > { %s1288_s30 = smov %s946_s9  ;;  %s1289_s9 = smov %s1040_s15 }
 0x2e9   : > { %s1290_s10 = smov %s1029_s12  ;;  %21 = sbr.rel (!%p19_p3) target bundleno = 5 (0x5), region = 87 }
 0x2f0   :  { %697 = vsyncpa [#allocation4], 1 }
 0x2f1   :  { %699 = vsyncpa [#allocation4 + $0x1], 1 }

</bundles_post_ra>
